<compile_context>
chip_gen: v6e
topology: v6e:2x2x1
jax: 0.10.0
libtpu: 0.0.40
codegen_flags: <defaults>
</compile_context>

<pallas_src>
import jax
import jax.numpy as jnp
from jax.experimental import pallas as pl
from jax.experimental.pallas import tpu as pltpu

_TARGET_BLOCK_BYTES = 8 * 1024 * 1024   # ~8 MiB input per block (byte-targeted tiling)
_MAX_LANE_TILE = 8192                   # lane-tile cap: bounds the unrolled chunk fold at 64
_VMEM_LIMIT = 40 * 1024 * 1024          # 2x8 MiB double-buffered + scratch, < v7x 64 MiB ceiling


def _round_up(x, m):
    return ((x + m - 1) // m) * m


def _make_single_pass_kernel(inv_hw):
    """HW fits in one lane tile: one block per row tile, single f32-accumulating lane reduce."""

    def kernel(x_ref, o_ref):
        s = jnp.sum(x_ref[...], axis=-1, keepdims=True, dtype=jnp.float32)
        o_ref[...] = (s * inv_hw).astype(o_ref.dtype)

    return kernel


def _make_streaming_kernel(inv_hw, hw_true, hw_tile, row_tile):
    """HW streamed over a trailing 'arbitrary' grid axis with a (row_tile, 128) f32 accumulator."""
    n_chunks = hw_tile // 128
    ragged_tail = (hw_true % hw_tile) != 0

    def accumulate(x_ref, acc_ref, hw_idx, masked):
        # Deferred cross-lane reduce: fold hw_tile lanes to 128 with plain VPU adds on
        # aligned 128-lane ref slices (zero-cost views, no relayout); write the VMEM
        # accumulator once per step.  The XLU reduce happens only on the final step.
        if masked:
            base = hw_idx * hw_tile
            lane = jax.lax.broadcasted_iota(jnp.int32, (row_tile, 128), 1)
        folded = jnp.zeros((row_tile, 128), jnp.float32)
        for c in range(n_chunks):
            sl = x_ref[:, c * 128:(c + 1) * 128]
            if masked:
                keep = (base + c * 128 + lane) < hw_true
                sl = jnp.where(keep, sl, jnp.zeros_like(sl))
            folded = folded + sl.astype(jnp.float32)
        acc_ref[...] += folded

    def kernel(x_ref, o_ref, acc_ref):
        hw_idx = pl.program_id(1)
        last = pl.num_programs(1) - 1

        @pl.when(hw_idx == 0)
        def _():
            acc_ref[...] = jnp.zeros_like(acc_ref)

        if ragged_tail:
            # Only the final HW tile overhangs the array; mask its undefined lanes to 0.
            @pl.when(hw_idx != last)
            def _():
                accumulate(x_ref, acc_ref, hw_idx, masked=False)

            @pl.when(hw_idx == last)
            def _():
                accumulate(x_ref, acc_ref, hw_idx, masked=True)
        else:
            accumulate(x_ref, acc_ref, hw_idx, masked=False)

        @pl.when(hw_idx == last)
        def _():
            total = jnp.sum(acc_ref[...], axis=-1, keepdims=True)
            o_ref[...] = (total * inv_hw).astype(o_ref.dtype)

    return kernel


def global_avg_pool2d(x):
    """x: (N, C, H, W) -> (N, C); mean over the flattened spatial dims (GlobalAvgPool2d)."""
    N, C, H, W = x.shape
    HW = H * W
    R = N * C

    if HW == 0:
        # mean over an empty axis: mirror torch's NaN result
        return jnp.full((N, C), jnp.nan, dtype=x.dtype)
    if R == 0:
        return jnp.zeros((N, C), dtype=x.dtype)

    x2 = x.reshape(R, HW)                      # glue reshape in plain JAX
    itemsize = jnp.dtype(x.dtype).itemsize
    inv_hw = 1.0 / float(HW)
    total_bytes = R * HW * itemsize

    # ---- tile sizing (byte-targeted, no padding) ---------------------------
    hw128 = _round_up(HW, 128)
    single_pass = hw128 <= _MAX_LANE_TILE

    if single_pass:
        hw_tile = HW                            # full reduction dim: no tail, no mask
        lanes_padded = hw128                    # VMEM tile is lane-padded to 128
        row_cap = max(8, (_TARGET_BLOCK_BYTES // (lanes_padded * itemsize)) // 8 * 8)
    else:
        hw_tile = _MAX_LANE_TILE                # multiple of 128; ragged tail masked in-kernel
        row_cap = max(8, min(256, (_TARGET_BLOCK_BYTES // (hw_tile * itemsize)) // 8 * 8))

    if R <= row_cap:
        if R >= 16 and total_bytes > (2 * 1024 * 1024):
            # keep >=2 row tiles so both v7x TensorCores get work on the "parallel" axis
            row_tile = _round_up((R + 1) // 2, 8)
        else:
            row_tile = R                        # full-dim row block (ok even if not mult. of 8)
    else:
        row_tile = row_cap                      # multiple of 8; last block ragged (rows dropped)

    num_row = pl.cdiv(R, row_tile)

    cost = pl.CostEstimate(
        flops=R * HW,
        transcendentals=0,
        bytes_accessed=R * HW * itemsize + R * itemsize,
    )

    if single_pass:
        out = pl.pallas_call(
            _make_single_pass_kernel(inv_hw),
            out_shape=jax.ShapeDtypeStruct((R, 1), x.dtype),
            grid_spec=pltpu.PrefetchScalarGridSpec(
                num_scalar_prefetch=0,
                grid=(num_row,),
                in_specs=[pl.BlockSpec((row_tile, hw_tile), lambda r: (r, 0))],
                out_specs=pl.BlockSpec((row_tile, 1), lambda r: (r, 0)),
            ),
            compiler_params=pltpu.CompilerParams(
                dimension_semantics=("parallel",),
                vmem_limit_bytes=_VMEM_LIMIT,
            ),
            cost_estimate=cost,
        )(x2)
    else:
        num_hw = pl.cdiv(HW, hw_tile)
        out = pl.pallas_call(
            _make_streaming_kernel(inv_hw, HW, hw_tile, row_tile),
            out_shape=jax.ShapeDtypeStruct((R, 1), x.dtype),
            grid_spec=pltpu.PrefetchScalarGridSpec(
                num_scalar_prefetch=0,
                grid=(num_row, num_hw),
                in_specs=[pl.BlockSpec((row_tile, hw_tile), lambda r, hw: (r, hw))],
                out_specs=pl.BlockSpec((row_tile, 1), lambda r, hw: (r, 0)),
                scratch_shapes=[pltpu.VMEM((row_tile, 128), jnp.float32)],
            ),
            compiler_params=pltpu.CompilerParams(
                dimension_semantics=("parallel", "arbitrary"),
                vmem_limit_bytes=_VMEM_LIMIT,
            ),
            cost_estimate=cost,
        )(x2)

    return out[:, 0].reshape(N, C)


if __name__ == "__main__":
    key = jax.random.PRNGKey(0)

    # 1) canonical small case (single-pass path)
    N, C, H, W = 2, 4, 16, 16
    x = jax.random.normal(key, (N, C, H, W), dtype=jnp.float32)
    out = jax.block_until_ready(global_avg_pool2d(x))
    ref = x.reshape(N, C, -1).mean(axis=2)
    assert out.shape == (N, C)
    assert jnp.allclose(out, ref, atol=1e-5, rtol=1e-5)

    # 2) awkward non-aligned shapes (non-multiple-of-8 rows, non-multiple-of-128 lanes)
    x2 = jax.random.normal(jax.random.PRNGKey(1), (3, 5, 7, 7), dtype=jnp.float32)
    out2 = jax.block_until_ready(global_avg_pool2d(x2))
    ref2 = x2.reshape(3, 5, -1).mean(axis=2)
    assert jnp.allclose(out2, ref2, atol=1e-5, rtol=1e-5)

    # 3) large-HW streaming path with a ragged, masked tail tile (HW = 9216 > 8192)
    x3 = jax.random.normal(jax.random.PRNGKey(2), (2, 3, 96, 96), dtype=jnp.float32)
    out3 = jax.block_until_ready(global_avg_pool2d(x3))
    ref3 = x3.reshape(2, 3, -1).mean(axis=2)
    assert jnp.allclose(out3, ref3, atol=1e-5, rtol=1e-5)

    print("KERNEL_OK")
</pallas_src>

<mosaic_0001>
module attributes {stable_mosaic.version = 11 : i64} {
  func.func @kernel(%arg0: i32, %arg1: memref<8x256xf32, #tpu.memory_space<vmem>>, %arg2: memref<8x1xf32, #tpu.memory_space<vmem>>) attributes {dimension_semantics = [#tpu.dimension_semantics<parallel>], iteration_bounds = array<i64: 1>, scalar_prefetch = 0 : i64, scratch_operands = 0 : i64, tpu.core_type = #tpu.core_type<tc>, window_params = [{transform_indices = @transform_0, window_bounds = array<i64: 8, 256>}, {transform_indices = @transform_1, window_bounds = array<i64: 8, 1>}]} {
    %c0 = arith.constant 0 : index
    %c0_0 = arith.constant 0 : index
    %0 = vector.load %arg1[%c0, %c0_0] : memref<8x256xf32, #tpu.memory_space<vmem>>, vector<8x256xf32>
    %cst = arith.constant dense<0.000000e+00> : vector<8xf32>
    %1 = vector.multi_reduction <add>, %0, %cst [1] : vector<8x256xf32> to vector<8xf32>
    %2 = vector.shape_cast %1 : vector<8xf32> to vector<8x1xf32>
    %cst_1 = arith.constant 3.906250e-03 : f32
    %3 = vector.broadcast %cst_1 : f32 to vector<8x1xf32>
    %4 = arith.mulf %2, %3 : vector<8x1xf32>
    %c0_2 = arith.constant 0 : index
    %c0_3 = arith.constant 0 : index
    %5 = vector.load %arg2[%c0_2, %c0_3] : memref<8x1xf32, #tpu.memory_space<vmem>>, vector<8x1xf32>
    tpu.vector_store %arg2[%c0_2, %c0_3], %4 {strides = array<i32>} : memref<8x1xf32, #tpu.memory_space<vmem>>, vector<8x1xf32>,
    return
  }
  func.func @transform_0(%arg0: i32) -> (i32, i32) {
    %c0_i32 = arith.constant 0 : i32
    %c0_i32_0 = arith.constant 0 : i32
    return %arg0, %c0_i32 : i32, i32
  }
  func.func @transform_1(%arg0: i32) -> (i32, i32) {
    %c0_i32 = arith.constant 0 : i32
    %c0_i32_0 = arith.constant 0 : i32
    return %arg0, %c0_i32 : i32, i32
  }
}

</mosaic_0001>

<bundles_post_ra>
// kernel: tpu_custom_call.1
= control target key start
LH: loop header
LB: loop body
LE: loop exit
PB: predicated region body
PF: predicated region fallthrough
CT: control target
= control target key end

     0   :  { %6 = vsyncpa [#allocation3], 0  ;;  %s56_s6 = smov [#allocation2]   ;;  %s73_s0 = inlined_call_operand.hbm [shape: f32[8,256], index: 0, kind: input, shape index: {}]   ;;  %s74_s1 = inlined_call_operand.vmem [shape: f32[8,1], index: 1, kind: output, shape index: {}]  }
   0x1   :  { %s13_s7 = sshll.u32 %s56_s6, 4  ;;  %s14_s7 = int_to_ptr.vmem [resolvable:$true] %s13_s7 }
   0x2   :  { %s42_s8 = scalar_lea.vmem %s14_s7, 256  ;;  %p47_p1 = scmp.lt.s32.totalorder %s14_s7, %s14_s7 }
   0x3   :  { %p43_p0 = scmp.ne.s32.totalorder %s14_s7, %s42_s8  ;;  %p48_p2 = scmp.lt.s32.totalorder %s42_s8, %s42_s8 }
   0x5   :  { %p49_p3 = por %p48_p2, %p47_p1 }
   0x7   :  { %p50_p4 = pnand %p49_p3, %p43_p0 }
   0x9   :  { %53 = shalt.err (!%p50_p4)
}
   0xa   :  { %16 = dma.hbm_to_vmem [thread:$0]  %s73_s0, 256, %s14_s7, [#allocation3]  }
   0xb   :  { %54 = dma.done.wait [#allocation3], 256  }
   0xc   :  { %55 = vsyncadd [#allocation3], 4294967040  ;;  %v20_v0 = vld [vmem:[#allocation2] sm:$0xff]  ;;  %v21_v1 = vld [vmem:[#allocation2 + $0x8] sm:$0xff]  ;;  %vm26_vm0 = vcmask 7168  }
   0xd   :  { %v22_v2 = vadd.f32 %v21_v1, %v20_v0 }
   0xf   :  { %23 = vadd.xlane.f32.xlu0 %v22_v2 }
  0x98   :  { %v24_v3 = vpop.xlane.xlu0 %23 }
  0x99   :  { %v25_v4 = vmul.f32 0.00390625, %v24_v3 }
  0x9b   :  { %27 = vst.msk [vmem:[%s74_s1] sm:$0xff] %vm26_vm0, %v25_v4 }
  0x9c   :  { %32 = vsyncpa [#allocation3], 1 }

</bundles_post_ra>
